<compile_context>
chip_gen: v7x
topology: tpu7x:2x2x1
jax: 0.10.0
libtpu: 0.0.40
codegen_flags: <defaults>
</compile_context>

<pallas_src>
import jax
import jax.numpy as jnp
from jax.experimental import pallas as pl
from jax.experimental.pallas import tpu as pltpu


def _convt_gelu_kernel(x_ref, w_ref, o_ref):
    # x_ref: (B, C+1) -- last column is all-ones, so the ConvT bias lives in
    # the last row of w_ref (bias folded into the matmul).
    # w_ref: (C+1, F) f32, o_ref: (B, F) in the caller's dtype.
    x = x_ref[...].astype(jnp.float32)  # in-kernel cast (free under DMA shadow)
    # v2 = ConvTranspose2d(v1) at 1x1 spatial == x @ w[:,:,1,1] + bias (MXU)
    v2 = jnp.dot(x, w_ref[...],
                 preferred_element_type=jnp.float32,
                 precision=jax.lax.Precision.HIGHEST)
    # elementwise tanh-GELU tail: VPU chain + one tanh on the EUP slot
    v3 = v2 * 0.5
    v7 = (v2 + 0.044715 * (v2 * v2 * v2)) * 0.7978845608028654
    v9 = jnp.tanh(v7) + 1.0
    # v10 = cat((x2, v9), dim=1): x2 necessarily has 0 channels, so v10 == v9
    o_ref[...] = (v3 * v9).astype(o_ref.dtype)


def _cost_estimate(B, K, F, in_itemsize, out_itemsize):
    return pl.CostEstimate(
        flops=int(2 * B * K * F + 10 * B * F),
        transcendentals=int(B * F),
        bytes_accessed=int(B * K * in_itemsize + K * F * 4 + B * F * out_itemsize),
    )


def _convt_gelu_small(x_aug, w_aug, out_dtype):
    """Gridless path for tiny B: whole arrays as single VMEM blocks."""
    B, K = x_aug.shape
    F = w_aug.shape[1]
    return pl.pallas_call(
        _convt_gelu_kernel,
        out_shape=jax.ShapeDtypeStruct((B, F), out_dtype),
        cost_estimate=_cost_estimate(B, K, F, x_aug.dtype.itemsize,
                                     jnp.dtype(out_dtype).itemsize),
    )(x_aug, w_aug)


def _convt_gelu_batched(x_aug, w_aug, out_dtype, tb=512):
    """Batched path: parallel grid over B, weight pinned VMEM-resident.

    tb=512 reaches ~85% of HBM roofline on a mem-bound kernel; the weight
    BlockSpec returns a constant block index so it is not re-DMA'd per step.
    Tile is tiny ((512, 10) + (512, 9) f32 ~ 40 KiB) so it fits the v7x
    32 MiB scoped-VMEM default with double buffering with huge margin.
    """
    B, K = x_aug.shape
    F = w_aug.shape[1]
    grid_b = pl.cdiv(B, tb)
    Bp = grid_b * tb
    if Bp != B:
        x_aug = jnp.pad(x_aug, ((0, Bp - B), (0, 0)))
    out = pl.pallas_call(
        _convt_gelu_kernel,
        out_shape=jax.ShapeDtypeStruct((Bp, F), out_dtype),
        grid_spec=pltpu.PrefetchScalarGridSpec(
            num_scalar_prefetch=0,
            grid=(grid_b,),
            in_specs=[
                pl.BlockSpec((tb, K), lambda i: (i, 0)),
                pl.BlockSpec((K, F), lambda i: (0, 0)),   # pinned weight block
            ],
            out_specs=pl.BlockSpec((tb, F), lambda i: (i, 0)),
        ),
        compiler_params=pltpu.CompilerParams(
            dimension_semantics=("parallel",)),
        cost_estimate=_cost_estimate(Bp, K, F, x_aug.dtype.itemsize,
                                     jnp.dtype(out_dtype).itemsize),
    )(x_aug, w_aug)
    return out[:B]


def prepare_params(weight, bias):
    """One-time parameter prep (hoisted out of the per-call forward path).

    weight: (Cin, Cout, 2, 2) ConvTranspose2d weight, bias: (Cout,).
    Returns w_aug of shape (Cin+1, Cout): the w[:, :, 1, 1] tap (the exact
    convT contribution at 1x1 spatial) with the bias appended as the last row,
    so the kernel needs a single matmul operand and no separate bias DMA.
    """
    w_tap = jnp.asarray(weight)[:, :, 1, 1].astype(jnp.float32)
    b_row = jnp.asarray(bias).astype(jnp.float32).reshape(1, -1)
    return jnp.concatenate([w_tap, b_row], axis=0)


@jax.jit
def model_forward(x1, x2, w_aug):
    """Pallas implementation of Model.forward (NCHW, shape-consistent config)."""
    # v1 = torch.cat((x1, x2), 1)   (glue; x2 necessarily has 0 channels)
    v1 = jnp.concatenate([x1, x2], axis=1)
    B, Cin, H, W = v1.shape
    F = w_aug.shape[1]
    assert (H, W) == (1, 1) and Cin == w_aug.shape[0] - 1 and x2.shape[1] == 0, (
        "original forward is only shape-consistent for H=W=1, C2=0")
    x_mat = v1.reshape(B, Cin)
    # bias-folding: append a ones column so bias rides inside the matmul
    x_aug = jnp.concatenate([x_mat, jnp.ones((B, 1), x_mat.dtype)], axis=1)
    out_dtype = x1.dtype  # preserve the caller's dtype (PyTorch-like)
    if B >= 512:
        out = _convt_gelu_batched(x_aug, w_aug, out_dtype)
    else:
        out = _convt_gelu_small(x_aug, w_aug, out_dtype)
    return out.reshape(B, F, 1, 1)


if __name__ == "__main__":
    import numpy as np

    key = jax.random.PRNGKey(0)
    k1, kw, kb = jax.random.split(key, 3)

    # the only shape-consistent inputs for this module's forward
    x1 = jax.random.normal(k1, (2, 9, 1, 1), jnp.float32)
    x2 = jnp.zeros((2, 0, 1, 1), jnp.float32)

    # deterministic ConvTranspose2d(9, 9, 2) parameters (torch-style uniform init)
    fan_in = 9 * 2 * 2
    bound = 1.0 / (fan_in ** 0.5)
    weight = jax.random.uniform(kw, (9, 9, 2, 2), jnp.float32, -bound, bound)
    bias = jax.random.uniform(kb, (9,), jnp.float32, -bound, bound)

    # one-time param prep (weights are constants across calls)
    w_aug = prepare_params(weight, bias)

    out = model_forward(x1, x2, w_aug)
    out = jax.block_until_ready(out)

    # float64 numpy reference, tight f32 tolerance (per review)
    xn = np.asarray(x1, dtype=np.float64).reshape(2, 9)
    wn = np.asarray(weight, dtype=np.float64)[:, :, 1, 1]
    bn = np.asarray(bias, dtype=np.float64)
    v2 = xn @ wn + bn
    v3 = v2 * 0.5
    v9 = np.tanh((v2 + 0.044715 * v2 ** 3) * 0.7978845608028654) + 1.0
    ref = (v3 * v9).reshape(2, 9, 1, 1)

    assert out.shape == (2, 9, 1, 1)
    assert out.dtype == x1.dtype
    np.testing.assert_allclose(np.asarray(out), ref, rtol=1e-5, atol=1e-5)

    print("KERNEL_OK")
</pallas_src>

<mosaic_0001>
module attributes {stable_mosaic.version = 11 : i64} {
  func.func @_convt_gelu_kernel(%arg0: memref<2x10xf32, #tpu.memory_space<vmem>>, %arg1: memref<10x9xf32, #tpu.memory_space<vmem>>, %arg2: memref<2x9xf32, #tpu.memory_space<vmem>>) attributes {dimension_semantics = [], scalar_prefetch = 0 : i64, scratch_operands = 0 : i64, tpu.core_type = #tpu.core_type<tc>} {
    %c0 = arith.constant 0 : index
    %c0_0 = arith.constant 0 : index
    %0 = vector.load %arg0[%c0, %c0_0] : memref<2x10xf32, #tpu.memory_space<vmem>>, vector<2x10xf32>
    %c0_1 = arith.constant 0 : index
    %c0_2 = arith.constant 0 : index
    %1 = vector.load %arg1[%c0_1, %c0_2] : memref<10x9xf32, #tpu.memory_space<vmem>>, vector<10x9xf32>
    %cst = arith.constant dense<0.000000e+00> : vector<2x9xf32>
    %2 = tpu.matmul %0, %1, %cst {dimension_numbers = #tpu.dot_dimension_numbers<[1], [0], [0], [1], [0, 0, 1, 1], [], []>, precision = #tpu.contract_precision<fp32>} : vector<2x10xf32>, vector<10x9xf32>, vector<2x9xf32> -> vector<2x9xf32>
    %cst_3 = arith.constant 5.000000e-01 : f32
    %3 = vector.broadcast %cst_3 : f32 to vector<2x9xf32>
    %4 = arith.mulf %2, %3 : vector<2x9xf32>
    %5 = arith.mulf %2, %2 : vector<2x9xf32>
    %6 = arith.mulf %5, %2 : vector<2x9xf32>
    %cst_4 = arith.constant 4.471500e-02 : f32
    %7 = vector.broadcast %cst_4 : f32 to vector<2x9xf32>
    %8 = arith.mulf %7, %6 : vector<2x9xf32>
    %9 = arith.addf %2, %8 : vector<2x9xf32>
    %cst_5 = arith.constant 0.797884583 : f32
    %10 = vector.broadcast %cst_5 : f32 to vector<2x9xf32>
    %11 = arith.mulf %9, %10 : vector<2x9xf32>
    %12 = math.tanh %11 : vector<2x9xf32>
    %cst_6 = arith.constant 1.000000e+00 : f32
    %13 = vector.broadcast %cst_6 : f32 to vector<2x9xf32>
    %14 = arith.addf %12, %13 : vector<2x9xf32>
    %15 = arith.mulf %4, %14 : vector<2x9xf32>
    %c0_7 = arith.constant 0 : index
    %c0_8 = arith.constant 0 : index
    %16 = vector.load %arg2[%c0_7, %c0_8] : memref<2x9xf32, #tpu.memory_space<vmem>>, vector<2x9xf32>
    tpu.vector_store %arg2[%c0_7, %c0_8], %15 {strides = array<i32>} : memref<2x9xf32, #tpu.memory_space<vmem>>, vector<2x9xf32>,
    return
  }
}

</mosaic_0001>

<bundles_post_ra>
// kernel: model_forward.1
= control target key start
LH: loop header
LB: loop body
LE: loop exit
PB: predicated region body
PF: predicated region fallthrough
CT: control target
= control target key end

     0   :  { %vm19_vm0 = vcmask 1041408   ;;  %v624_v2 = vmov 0.0|0.0   ;;  %vm15_vm1 = vcmask 80896   ;;  %vm625_vm2 = vmmov 0   ;;  %s670_s0 = inlined_call_operand.vmem [shape: f32[2,10], index: 0, kind: input, shape index: {}]   ;;  %s671_s1 = inlined_call_operand.vmem [shape: f32[10,9], index: 1, kind: input, shape index: {}]   ;;  %s672_s2 = inlined_call_operand.hbm [shape: f32[2,9], index: 2, kind: output, shape index: {}]  }
   0x1   :  { %v13_v0 = vld [vmem:[%s671_s1] sm:$0xff]  ;;  %v14_v1 = vld [vmem:[%s671_s1 + $0x8] sm:$0x3]  ;;  %576 = vmatprep.subr.bf16.mxu0 %v624_v2  ;;  %567 = vmatprep.subr.bf16.mxu1 %v624_v2  ;;  %v626_v7 = vmov 0.0  }
   0x2   :  { %v21_v3 = vsel %vm19_vm0, %v14_v1, 0  ;;  %v24_v4 = vand.u32 4294901760, %v13_v0  ;;  %v12_v5 = vld [vmem:[%s670_s0] sm:$0x3]  ;;  %550 = vmatprep.mubr.msk.f32.mxu0 %vm625_vm2, %v626_v7  ;;  %529 = vmatprep.mubr.msk.f32.mxu1 %vm625_vm2, %v626_v7 }
   0x3   :  { %v27_v6 = vand.u32 4294901760, %v21_v3  ;;  %v17_v8 = vsel %vm15_vm1, %v12_v5, 0 }
   0x4   :  { %7 = vsyncpa [#allocation3], 0  ;;  %v102_v9 = vsub.f32 %v13_v0, %v24_v4  ;;  %v90_v10 = vand.u32 4294901760, %v17_v8  ;;  %s627_s0 = smov [#allocation2]   ;;  %vm491_vm3 = vcmask 66560  }
   0x5   :  { %v568_v11 = vpack.c.bf16 %v27_v6, %v24_v4  ;;  %v109_v12 = vsub.f32 %v21_v3, %v27_v6  ;;  %s499_s1 = sshll.u32 %s627_s0, 4  ;;  %s500_s1 = int_to_ptr.vmem [resolvable:$true] %s499_s1 }
   0x6   :  { %v91_v13 = vsub.f32 %v17_v8, %v90_v10  ;;  %v103_v14 = vand.u32 4294901760, %v102_v9  ;;  %s600_s15 = scalar_lea.vmem %s500_s1, 32  ;;  %p605_p1 = scmp.lt.s32.totalorder %s500_s1, %s500_s1 }
   0x7   :  { %578 = vmatpush3.bf16.msra.mxu0 %v568_v11  ;;  %569 = vmatpush3.bf16.msra.mxu1 %v568_v11  ;;  %v110_v15 = vand.u32 4294901760, %v109_v12  ;;  %v574_v25 = vpack.c.bf16 %v109_v12, %v102_v9  ;;  %p601_p0 = scmp.ne.s32.totalorder %s500_s1, %s600_s15  ;;  %p606_p2 = scmp.lt.s32.totalorder %s600_s15, %s600_s15 }
   0x8   :  { %v92_v16 = vand.u32 4294901760, %v91_v13  ;;  %570 = vmatprep.subr.bf16.mxu1 %v624_v2  ;;  %579 = vmatprep.subr.bf16.mxu0 %v624_v2  ;;  %v104_v17 = vsub.f32 %v102_v9, %v103_v14 }
   0x9   :  { %v111_v18 = vsub.f32 %v109_v12, %v110_v15  ;;  %v580_v19 = vpack.c.bf16 %v110_v15, %v103_v14  ;;  %p607_p3 = por %p606_p2, %p605_p1 }
   0xa   :  { %551 = vmatmul.mubr.f32.vlgmr.msra.gmra.mrb[0].mxu0 %v92_v16  ;;  %v93_v20 = vsub.f32 %v91_v13, %v92_v16  ;;  %v105_v21 = vand.u32 4294901760, %v104_v17 }
   0xb   :  { %v112_v22 = vand.u32 4294901760, %v111_v18  ;;  %581 = vmatpush3.bf16.msra.mxu0 %v580_v19  ;;  %557 = vmatprep.mubr.msk.f32.mxu0 %vm625_vm2, %v626_v7  ;;  %p608_p4 = pnand %p607_p3, %p601_p0 }
   0xc   :  { %v94_v23 = vand.u32 4294901760, %v93_v20  ;;  %582 = vmatprep.subr.bf16.mxu0 %v624_v2 }
   0xd   :  { %v571_v24 = vpack.c.bf16 %v112_v22, %v105_v21 }
   0xe   :  { %530 = vmatmul.mubr.f32.vlgmr.msra.gmra.mrb[0].mxu1 %v94_v23 }
   0xf   :  { %572 = vmatpush3.bf16.msra.mxu1 %v571_v24  ;;  %536 = vmatprep.mubr.msk.f32.mxu1 %vm625_vm2, %v626_v7 }
  0x10   :  { %573 = vmatprep.subr.bf16.mxu1 %v624_v2 }
  0x12   :  { %558 = vmatmul.mubr.f32.vlgmr.msra.gmra.mrb[0].mxu0 %v90_v10 }
  0x13   :  { %584 = vmatpush3.bf16.msra.mxu0 %v568_v11  ;;  %564 = vmatprep.mubr.msk.f32.mxu0 %vm625_vm2, %v626_v7 }
  0x16   :  { %537 = vmatmul.mubr.f32.vlgmr.msra.gmra.mrb[0].mxu1 %v90_v10 }
  0x17   :  { %575 = vmatpush3.bf16.msra.mxu1 %v574_v25  ;;  %543 = vmatprep.mubr.msk.f32.mxu1 %vm625_vm2, %v626_v7 }
  0x1a   :  { %565 = vmatmul.mubr.f32.vlgmr.msra.gmra.mrb[0].mxu0 %v90_v10 }
  0x1e   :  { %544 = vmatmul.mubr.f32.vlgmr.msra.gmra.mrb[0].mxu1 %v91_v13 }
  0xed   :  { %v478_v26 = vpop.f32.mrb[0].mxu0 }
  0xee   :  { %v566_v27 = vpop.f32.mrb[1].mxu0 }
  0xf1   :  { %v253_v28 = vpop.f32.mrb[0].mxu1 }
  0xf2   :  { %v585_v29 = vadd.f32 %v478_v26, %v253_v28  ;;  %v545_v30 = vpop.f32.mrb[1].mxu1 }
  0xf4   :  { %v483_v31 = vmul.f32 %v585_v29, %v585_v29  ;;  %v482_v37 = vmul.f32 0.5, %v585_v29 }
  0xf6   :  { %v484_v32 = vmul.f32 %v585_v29, %v483_v31 }
  0xf8   :  { %v485_v33 = vmul.f32 0.044715, %v484_v32 }
  0xfa   :  { %v486_v34 = vadd.f32 %v585_v29, %v485_v33 }
  0xfc   :  { %v487_v35 = vmul.f32 0.7978846, %v486_v34 }
  0xfe   :  { %598 = vtanh.f32 %v487_v35 }
 0x108   :  { %v599_v36 = vpop.eup %598 }
 0x109   :  { %v489_v38 = vadd.f32 1.0, %v599_v36 }
 0x10b   :  { %v490_v39 = vmul.f32 %v489_v38, %v482_v37 }
 0x10d   :  { %492 = vst.msk [vmem:[#allocation2] sm:$0x3] %vm491_vm3, %v490_v39 }
 0x10e   :  { %611 = shalt.err (!%p608_p4)
}
 0x10f   :  { %s612_s18 = scalar_lea.hbm %s672_s2, 32 }
 0x110   :  { %p613_p5 = scmp.ne.s32.totalorder %s672_s2, %s612_s18  ;;  %p616_p6 = scmp.lt.u32.totalorder %s612_s18, %s672_s2 }
 0x112   :  { %p618_p7 = pnand %p616_p6, %p613_p5 }
 0x114   :  { %621 = shalt.err (!%p618_p7)
}
 0x115   :  { %502 = dma.vmem_to_hbm [thread:$0]  %s500_s1, 32, %s672_s2, [#allocation3]  }
 0x116   :  { %622 = dma.done.wait [#allocation3], 32  }
 0x117   :  { %623 = vsyncadd [#allocation3], 4294967264 }
 0x118   :  { %506 = vsyncpa [#allocation3], 1 }

</bundles_post_ra>
